<compile_context>
chip_gen: v5e
topology: v5e:2x2
jax: 0.10.0
libtpu: 0.0.40
codegen_flags: <defaults>
</compile_context>

<pallas_src>
import functools

import jax
import jax.numpy as jnp
from jax.experimental import pallas as pl
from jax.experimental.pallas import tpu as pltpu

DROP_P = 0.5                      # F.dropout default
DROP_SCALE = 1.0 / (1.0 - DROP_P)
OUT_DIM = 5
OUT_PAD = 128                     # lane-dense output width


def _round_up(x, m):
    return (x + m - 1) // m * m


def _hash_bits(shape, salt_u32):
    """Counter-based 32-bit hash (xorshift-multiply finalizer). Pure jnp ops,
    so it lowers on TPU Mosaic and in interpret mode alike."""
    rows = jax.lax.broadcasted_iota(jnp.uint32, shape, 0)
    cols = jax.lax.broadcasted_iota(jnp.uint32, shape, 1)
    x = rows * jnp.uint32(shape[1]) + cols + salt_u32
    x = x ^ (x >> 16)
    x = x * jnp.uint32(0x7FEB352D)
    x = x ^ (x >> 15)
    x = x * jnp.uint32(0x846CA68B)
    x = x ^ (x >> 16)
    return x


def mlp_kernel(seed_ref, x_ref, w1_ref, b1_ref, w2_ref, b2_ref,
               w3_ref, b3_ref, w4_ref, b4_ref, o_ref):
    # Per-tile salt: seed + golden-ratio * program_id -> independent masks per tile.
    salt = (seed_ref[0].astype(jnp.uint32)
            + jnp.uint32(0x9E3779B9) * pl.program_id(0).astype(jnp.uint32))

    # fc1 + ReLU  (bf16 MXU operands, f32 accumulate)
    x = x_ref[...].astype(jnp.bfloat16)
    h = jnp.dot(x, w1_ref[...], preferred_element_type=jnp.float32) + b1_ref[...]
    h = jnp.maximum(h, 0.0)

    # fc2 + ReLU
    h = jnp.dot(h.astype(jnp.bfloat16), w2_ref[...],
                preferred_element_type=jnp.float32) + b2_ref[...]
    h = jnp.maximum(h, 0.0)

    # One (TILE_B, 256) block of random bits covers both dropout layers.
    bits = _hash_bits(h.shape, salt)                  # uint32
    keep2 = (bits >> 31) == 1                         # p_keep = 0.5 (high bit)
    h = jnp.where(keep2, h * DROP_SCALE, 0.0)

    # fc3 + ReLU
    h = jnp.dot(h.astype(jnp.bfloat16), w3_ref[...],
                preferred_element_type=jnp.float32) + b3_ref[...]
    h = jnp.maximum(h, 0.0)

    # second dropout reuses bit 30 of the first 64 lanes
    keep3 = ((bits[:, :64] >> 30) & 1) == 1
    h = jnp.where(keep3, h * DROP_SCALE, 0.0)

    # out layer, padded to 128 lanes for an unmasked store
    o_ref[...] = (jnp.dot(h.astype(jnp.bfloat16), w4_ref[...],
                          preferred_element_type=jnp.float32)
                  + b4_ref[...]).astype(o_ref.dtype)


def init_params(key, n_inputs):
    """nn.Linear-style init: U(-1/sqrt(fan_in), 1/sqrt(fan_in)).
    Weights stored (in_features, out_features) so the kernel does x @ W + b."""
    dims = [(n_inputs, 64), (64, 256), (256, 64), (64, OUT_DIM)]
    params = []
    for fin, fout in dims:
        key, kw, kb = jax.random.split(key, 3)
        bound = 1.0 / (fin ** 0.5)
        w = jax.random.uniform(kw, (fin, fout), jnp.float32, -bound, bound)
        b = jax.random.uniform(kb, (fout,), jnp.float32, -bound, bound)
        params += [w, b]
    return params


@functools.partial(jax.jit, static_argnames=("tile_b",))
def mlp_forward(data, params, seed=0, *, tile_b=512):
    """Forward pass of Model (the `target` arg of the torch forward is unused)."""
    w1, b1, w2, b2, w3, b3, w4, b4 = params
    B, n_inputs = data.shape

    # --- batch tiling -------------------------------------------------------
    b_pad = _round_up(B, 8)
    tile_b = min(tile_b, b_pad)
    b_pad = _round_up(b_pad, tile_b)
    if b_pad != B:
        data = jnp.pad(data, ((0, b_pad - B), (0, 0)))
    n_tiles = b_pad // tile_b

    # --- parameter prep: bf16 weights, f32 biases, lane-dense out layer ------
    w1b = w1.astype(jnp.bfloat16)
    w2b = w2.astype(jnp.bfloat16)
    w3b = w3.astype(jnp.bfloat16)
    w4p = jnp.pad(w4, ((0, 0), (0, OUT_PAD - OUT_DIM))).astype(jnp.bfloat16)
    b1r = b1.reshape(1, -1)
    b2r = b2.reshape(1, -1)
    b3r = b3.reshape(1, -1)
    b4p = jnp.pad(b4, (0, OUT_PAD - OUT_DIM)).reshape(1, -1)

    seed_arr = jnp.asarray([seed], dtype=jnp.int32)

    wspec = lambda shape: pl.BlockSpec(shape, lambda i, s: (0, 0))
    grid_spec = pltpu.PrefetchScalarGridSpec(
        num_scalar_prefetch=1,
        grid=(n_tiles,),
        in_specs=[
            pl.BlockSpec((tile_b, n_inputs), lambda i, s: (i, 0)),   # x tile
            wspec((n_inputs, 64)), wspec((1, 64)),                   # fc1
            wspec((64, 256)),      wspec((1, 256)),                  # fc2
            wspec((256, 64)),      wspec((1, 64)),                   # fc3
            wspec((64, OUT_PAD)),  wspec((1, OUT_PAD)),              # out (padded)
        ],
        out_specs=pl.BlockSpec((tile_b, OUT_PAD), lambda i, s: (i, 0)),
    )

    flops = 2 * b_pad * (n_inputs * 64 + 64 * 256 + 256 * 64 + 64 * OUT_PAD)
    weight_bytes = sum(int(p.size) * 4 for p in (w1, b1, w2, b2, w3, b3, w4, b4))
    bytes_accessed = b_pad * n_inputs * 4 + b_pad * OUT_PAD * 4 + weight_bytes

    out_pad = pl.pallas_call(
        mlp_kernel,
        out_shape=jax.ShapeDtypeStruct((b_pad, OUT_PAD), jnp.float32),
        grid_spec=grid_spec,
        compiler_params=pltpu.CompilerParams(
            dimension_semantics=("parallel",)),
        cost_estimate=pl.CostEstimate(
            flops=flops, transcendentals=0, bytes_accessed=bytes_accessed),
    )(seed_arr, data, w1b, b1r, w2b, b2r, w3b, b3r, w4p, b4p)

    return out_pad[:B, :OUT_DIM]


if __name__ == "__main__":
    key = jax.random.PRNGKey(0)
    k_data, k_params = jax.random.split(key)

    B, N_INPUTS = 8, 32
    data = jax.random.normal(k_data, (B, N_INPUTS), dtype=jnp.float32)
    params = init_params(k_params, N_INPUTS)

    yout = mlp_forward(data, params, seed=0)
    jax.block_until_ready(yout)
    assert yout.shape == (B, OUT_DIM) and yout.dtype == jnp.float32
    assert bool(jnp.all(jnp.isfinite(yout)))
    print("KERNEL_OK")
</pallas_src>

<mosaic_0001>
module attributes {stable_mosaic.version = 11 : i64} {
  func.func @mlp_kernel(%arg0: i32, %arg1: memref<1xi32, #tpu.memory_space<smem>>, %arg2: memref<8x32xf32, #tpu.memory_space<vmem>>, %arg3: memref<32x64xbf16, #tpu.memory_space<vmem>>, %arg4: memref<1x64xf32, #tpu.memory_space<vmem>>, %arg5: memref<64x256xbf16, #tpu.memory_space<vmem>>, %arg6: memref<1x256xf32, #tpu.memory_space<vmem>>, %arg7: memref<256x64xbf16, #tpu.memory_space<vmem>>, %arg8: memref<1x64xf32, #tpu.memory_space<vmem>>, %arg9: memref<64x128xbf16, #tpu.memory_space<vmem>>, %arg10: memref<1x128xf32, #tpu.memory_space<vmem>>, %arg11: memref<8x128xf32, #tpu.memory_space<vmem>>) attributes {dimension_semantics = [#tpu.dimension_semantics<parallel>], iteration_bounds = array<i64: 1>, scalar_prefetch = 1 : i64, scratch_operands = 0 : i64, tpu.core_type = #tpu.core_type<tc>, window_params = [{transform_indices = @transform_0, window_bounds = array<i64: 8, 32>}, {pipeline_mode = #tpu.pipeline_mode<synchronous>, transform_indices = @transform_1, window_bounds = array<i64: 32, 64>}, {pipeline_mode = #tpu.pipeline_mode<synchronous>, transform_indices = @transform_2, window_bounds = array<i64: 1, 64>}, {pipeline_mode = #tpu.pipeline_mode<synchronous>, transform_indices = @transform_3, window_bounds = array<i64: 64, 256>}, {pipeline_mode = #tpu.pipeline_mode<synchronous>, transform_indices = @transform_4, window_bounds = array<i64: 1, 256>}, {pipeline_mode = #tpu.pipeline_mode<synchronous>, transform_indices = @transform_5, window_bounds = array<i64: 256, 64>}, {pipeline_mode = #tpu.pipeline_mode<synchronous>, transform_indices = @transform_6, window_bounds = array<i64: 1, 64>}, {pipeline_mode = #tpu.pipeline_mode<synchronous>, transform_indices = @transform_7, window_bounds = array<i64: 64, 128>}, {pipeline_mode = #tpu.pipeline_mode<synchronous>, transform_indices = @transform_8, window_bounds = array<i64: 1, 128>}, {transform_indices = @transform_9, window_bounds = array<i64: 8, 128>}]} {
    %c0 = arith.constant 0 : index
    %0 = memref.load %arg1[%c0] : memref<1xi32, #tpu.memory_space<smem>>
    %c-1640531527_i32 = arith.constant -1640531527 : i32
    %1 = arith.muli %c-1640531527_i32, %arg0 : i32
    %2 = arith.addi %0, %1 : i32
    %c0_0 = arith.constant 0 : index
    %c0_1 = arith.constant 0 : index
    %3 = vector.load %arg2[%c0_0, %c0_1] : memref<8x32xf32, #tpu.memory_space<vmem>>, vector<8x32xf32>
    %4 = arith.truncf %3 : vector<8x32xf32> to vector<8x32xbf16>
    %c0_2 = arith.constant 0 : index
    %c0_3 = arith.constant 0 : index
    %5 = vector.load %arg3[%c0_2, %c0_3] : memref<32x64xbf16, #tpu.memory_space<vmem>>, vector<32x64xbf16>
    %cst = arith.constant dense<0.000000e+00> : vector<8x64xf32>
    %6 = tpu.matmul %4, %5, %cst {dimension_numbers = #tpu.dot_dimension_numbers<[1], [0], [0], [1], [0, 0, 1, 1], [], []>} : vector<8x32xbf16>, vector<32x64xbf16>, vector<8x64xf32> -> vector<8x64xf32>
    %c0_4 = arith.constant 0 : index
    %c0_5 = arith.constant 0 : index
    %7 = vector.load %arg4[%c0_4, %c0_5] : memref<1x64xf32, #tpu.memory_space<vmem>>, vector<1x64xf32>
    %8 = vector.broadcast %7 : vector<1x64xf32> to vector<8x64xf32>
    %9 = arith.addf %6, %8 : vector<8x64xf32>
    %cst_6 = arith.constant 0.000000e+00 : f32
    %10 = vector.broadcast %cst_6 : f32 to vector<8x64xf32>
    %11 = arith.maximumf %9, %10 : vector<8x64xf32>
    %12 = arith.truncf %11 : vector<8x64xf32> to vector<8x64xbf16>
    %c0_7 = arith.constant 0 : index
    %c0_8 = arith.constant 0 : index
    %13 = vector.load %arg5[%c0_7, %c0_8] : memref<64x256xbf16, #tpu.memory_space<vmem>>, vector<64x256xbf16>
    %cst_9 = arith.constant dense<0.000000e+00> : vector<8x256xf32>
    %14 = tpu.matmul %12, %13, %cst_9 {dimension_numbers = #tpu.dot_dimension_numbers<[1], [0], [0], [1], [0, 0, 1, 1], [], []>} : vector<8x64xbf16>, vector<64x256xbf16>, vector<8x256xf32> -> vector<8x256xf32>
    %c0_10 = arith.constant 0 : index
    %c0_11 = arith.constant 0 : index
    %15 = vector.load %arg6[%c0_10, %c0_11] : memref<1x256xf32, #tpu.memory_space<vmem>>, vector<1x256xf32>
    %16 = vector.broadcast %15 : vector<1x256xf32> to vector<8x256xf32>
    %17 = arith.addf %14, %16 : vector<8x256xf32>
    %cst_12 = arith.constant 0.000000e+00 : f32
    %18 = vector.broadcast %cst_12 : f32 to vector<8x256xf32>
    %19 = arith.maximumf %17, %18 : vector<8x256xf32>
    %20 = tpu.iota {dimensions = array<i32: 0>} : vector<8x256xi32>
    %21 = tpu.iota {dimensions = array<i32: 1>} : vector<8x256xi32>
    %c256_i32 = arith.constant 256 : i32
    %22 = vector.broadcast %c256_i32 : i32 to vector<8x256xi32>
    %23 = arith.muli %20, %22 : vector<8x256xi32>
    %24 = arith.addi %23, %21 : vector<8x256xi32>
    %25 = vector.broadcast %2 : i32 to vector<8x256xi32>
    %26 = arith.addi %24, %25 : vector<8x256xi32>
    %c16_i32 = arith.constant 16 : i32
    %27 = vector.broadcast %c16_i32 : i32 to vector<8x256xi32>
    %28 = arith.shrui %26, %27 : vector<8x256xi32>
    %29 = arith.xori %26, %28 : vector<8x256xi32>
    %c2146121005_i32 = arith.constant 2146121005 : i32
    %30 = vector.broadcast %c2146121005_i32 : i32 to vector<8x256xi32>
    %31 = arith.muli %29, %30 : vector<8x256xi32>
    %c15_i32 = arith.constant 15 : i32
    %32 = vector.broadcast %c15_i32 : i32 to vector<8x256xi32>
    %33 = arith.shrui %31, %32 : vector<8x256xi32>
    %34 = arith.xori %31, %33 : vector<8x256xi32>
    %c-2073254261_i32 = arith.constant -2073254261 : i32
    %35 = vector.broadcast %c-2073254261_i32 : i32 to vector<8x256xi32>
    %36 = arith.muli %34, %35 : vector<8x256xi32>
    %c16_i32_13 = arith.constant 16 : i32
    %37 = vector.broadcast %c16_i32_13 : i32 to vector<8x256xi32>
    %38 = arith.shrui %36, %37 : vector<8x256xi32>
    %39 = arith.xori %36, %38 : vector<8x256xi32>
    %c31_i32 = arith.constant 31 : i32
    %40 = vector.broadcast %c31_i32 : i32 to vector<8x256xi32>
    %41 = arith.shrui %39, %40 : vector<8x256xi32>
    %c1_i32 = arith.constant 1 : i32
    %42 = vector.broadcast %c1_i32 : i32 to vector<8x256xi32>
    %43 = arith.cmpi eq, %41, %42 : vector<8x256xi32>
    %cst_14 = arith.constant 2.000000e+00 : f32
    %44 = vector.broadcast %cst_14 : f32 to vector<8x256xf32>
    %45 = arith.mulf %19, %44 : vector<8x256xf32>
    %cst_15 = arith.constant 0.000000e+00 : f32
    %46 = vector.broadcast %cst_15 : f32 to vector<8x256xf32>
    %47 = arith.select %43, %45, %46 : vector<8x256xi1>, vector<8x256xf32>
    %48 = arith.truncf %47 : vector<8x256xf32> to vector<8x256xbf16>
    %c0_16 = arith.constant 0 : index
    %c0_17 = arith.constant 0 : index
    %49 = vector.load %arg7[%c0_16, %c0_17] : memref<256x64xbf16, #tpu.memory_space<vmem>>, vector<256x64xbf16>
    %cst_18 = arith.constant dense<0.000000e+00> : vector<8x64xf32>
    %50 = tpu.matmul %48, %49, %cst_18 {dimension_numbers = #tpu.dot_dimension_numbers<[1], [0], [0], [1], [0, 0, 1, 1], [], []>} : vector<8x256xbf16>, vector<256x64xbf16>, vector<8x64xf32> -> vector<8x64xf32>
    %c0_19 = arith.constant 0 : index
    %c0_20 = arith.constant 0 : index
    %51 = vector.load %arg8[%c0_19, %c0_20] : memref<1x64xf32, #tpu.memory_space<vmem>>, vector<1x64xf32>
    %52 = vector.broadcast %51 : vector<1x64xf32> to vector<8x64xf32>
    %53 = arith.addf %50, %52 : vector<8x64xf32>
    %cst_21 = arith.constant 0.000000e+00 : f32
    %54 = vector.broadcast %cst_21 : f32 to vector<8x64xf32>
    %55 = arith.maximumf %53, %54 : vector<8x64xf32>
    %56 = vector.extract_strided_slice %39 {offsets = [0, 0], sizes = [8, 64], strides = [1, 1]} : vector<8x256xi32> to vector<8x64xi32>
    %c30_i32 = arith.constant 30 : i32
    %57 = vector.broadcast %c30_i32 : i32 to vector<8x64xi32>
    %58 = arith.shrui %56, %57 : vector<8x64xi32>
    %c1_i32_22 = arith.constant 1 : i32
    %59 = vector.broadcast %c1_i32_22 : i32 to vector<8x64xi32>
    %60 = arith.andi %58, %59 : vector<8x64xi32>
    %c1_i32_23 = arith.constant 1 : i32
    %61 = vector.broadcast %c1_i32_23 : i32 to vector<8x64xi32>
    %62 = arith.cmpi eq, %60, %61 : vector<8x64xi32>
    %cst_24 = arith.constant 2.000000e+00 : f32
    %63 = vector.broadcast %cst_24 : f32 to vector<8x64xf32>
    %64 = arith.mulf %55, %63 : vector<8x64xf32>
    %cst_25 = arith.constant 0.000000e+00 : f32
    %65 = vector.broadcast %cst_25 : f32 to vector<8x64xf32>
    %66 = arith.select %62, %64, %65 : vector<8x64xi1>, vector<8x64xf32>
    %67 = arith.truncf %66 : vector<8x64xf32> to vector<8x64xbf16>
    %c0_26 = arith.constant 0 : index
    %c0_27 = arith.constant 0 : index
    %68 = vector.load %arg9[%c0_26, %c0_27] : memref<64x128xbf16, #tpu.memory_space<vmem>>, vector<64x128xbf16>
    %cst_28 = arith.constant dense<0.000000e+00> : vector<8x128xf32>
    %69 = tpu.matmul %67, %68, %cst_28 {dimension_numbers = #tpu.dot_dimension_numbers<[1], [0], [0], [1], [0, 0, 1, 1], [], []>} : vector<8x64xbf16>, vector<64x128xbf16>, vector<8x128xf32> -> vector<8x128xf32>
    %c0_29 = arith.constant 0 : index
    %c0_30 = arith.constant 0 : index
    %70 = vector.load %arg10[%c0_29, %c0_30] : memref<1x128xf32, #tpu.memory_space<vmem>>, vector<1x128xf32>
    %71 = vector.broadcast %70 : vector<1x128xf32> to vector<8x128xf32>
    %72 = arith.addf %69, %71 : vector<8x128xf32>
    %c0_31 = arith.constant 0 : index
    %c0_32 = arith.constant 0 : index
    %73 = vector.load %arg11[%c0_31, %c0_32] : memref<8x128xf32, #tpu.memory_space<vmem>>, vector<8x128xf32>
    tpu.vector_store %arg11[%c0_31, %c0_32], %72 {strides = array<i32>} : memref<8x128xf32, #tpu.memory_space<vmem>>, vector<8x128xf32>,
    return
  }
  func.func @transform_0(%arg0: i32, %arg1: memref<1xi32, #tpu.memory_space<smem>>) -> (i32, i32) {
    %c0_i32 = arith.constant 0 : i32
    %c0_i32_0 = arith.constant 0 : i32
    return %arg0, %c0_i32 : i32, i32
  }
  func.func @transform_1(%arg0: i32, %arg1: memref<1xi32, #tpu.memory_space<smem>>) -> (i32, i32) {
    %c0_i32 = arith.constant 0 : i32
    %c0_i32_0 = arith.constant 0 : i32
    %c0_i32_1 = arith.constant 0 : i32
    return %c0_i32, %c0_i32_0 : i32, i32
  }
  func.func @transform_2(%arg0: i32, %arg1: memref<1xi32, #tpu.memory_space<smem>>) -> (i32, i32) {
    %c0_i32 = arith.constant 0 : i32
    %c0_i32_0 = arith.constant 0 : i32
    %c0_i32_1 = arith.constant 0 : i32
    return %c0_i32, %c0_i32_0 : i32, i32
  }
  func.func @transform_3(%arg0: i32, %arg1: memref<1xi32, #tpu.memory_space<smem>>) -> (i32, i32) {
    %c0_i32 = arith.constant 0 : i32
    %c0_i32_0 = arith.constant 0 : i32
    %c0_i32_1 = arith.constant 0 : i32
    return %c0_i32, %c0_i32_0 : i32, i32
  }
  func.func @transform_4(%arg0: i32, %arg1: memref<1xi32, #tpu.memory_space<smem>>) -> (i32, i32) {
    %c0_i32 = arith.constant 0 : i32
    %c0_i32_0 = arith.constant 0 : i32
    %c0_i32_1 = arith.constant 0 : i32
    return %c0_i32, %c0_i32_0 : i32, i32
  }
  func.func @transform_5(%arg0: i32, %arg1: memref<1xi32, #tpu.memory_space<smem>>) -> (i32, i32) {
    %c0_i32 = arith.constant 0 : i32
    %c0_i32_0 = arith.constant 0 : i32
    %c0_i32_1 = arith.constant 0 : i32
    return %c0_i32, %c0_i32_0 : i32, i32
  }
  func.func @transform_6(%arg0: i32, %arg1: memref<1xi32, #tpu.memory_space<smem>>) -> (i32, i32) {
    %c0_i32 = arith.constant 0 : i32
    %c0_i32_0 = arith.constant 0 : i32
    %c0_i32_1 = arith.constant 0 : i32
    return %c0_i32, %c0_i32_0 : i32, i32
  }
  func.func @transform_7(%arg0: i32, %arg1: memref<1xi32, #tpu.memory_space<smem>>) -> (i32, i32) {
    %c0_i32 = arith.constant 0 : i32
    %c0_i32_0 = arith.constant 0 : i32
    %c0_i32_1 = arith.constant 0 : i32
    return %c0_i32, %c0_i32_0 : i32, i32
  }
  func.func @transform_8(%arg0: i32, %arg1: memref<1xi32, #tpu.memory_space<smem>>) -> (i32, i32) {
    %c0_i32 = arith.constant 0 : i32
    %c0_i32_0 = arith.constant 0 : i32
    %c0_i32_1 = arith.constant 0 : i32
    return %c0_i32, %c0_i32_0 : i32, i32
  }
  func.func @transform_9(%arg0: i32, %arg1: memref<1xi32, #tpu.memory_space<smem>>) -> (i32, i32) {
    %c0_i32 = arith.constant 0 : i32
    %c0_i32_0 = arith.constant 0 : i32
    return %arg0, %c0_i32 : i32, i32
  }
}

</mosaic_0001>

<bundles_post_ra>
// kernel: mlp_forward.1
= control target key start
LH: loop header
LB: loop body
LE: loop exit
PB: predicated region body
PF: predicated region fallthrough
CT: control target
= control target key end

     0   :  { %s821_s0 = inlined_call_operand.<no memory space> [shape: s32[1], index: 0, kind: input, shape index: {}]   ;;  %s822_s1 = inlined_call_operand.vmem [shape: f32[8,32], index: 1, kind: input, shape index: {}]   ;;  %s823_s2 = inlined_call_operand.vmem [shape: bf16[32,64], index: 2, kind: input, shape index: {}]   ;;  %s824_s3 = inlined_call_operand.vmem [shape: f32[1,64], index: 3, kind: input, shape index: {}]   ;;  %s825_s4 = inlined_call_operand.vmem [shape: bf16[64,256], index: 4, kind: input, shape index: {}]   ;;  %s826_s5 = inlined_call_operand.vmem [shape: f32[1,256], index: 5, kind: input, shape index: {}]   ;;  %s827_s6 = inlined_call_operand.vmem [shape: bf16[256,64], index: 6, kind: input, shape index: {}]   ;;  %s828_s7 = inlined_call_operand.vmem [shape: f32[1,64], index: 7, kind: input, shape index: {}]   ;;  %s829_s8 = inlined_call_operand.vmem [shape: bf16[64,128], index: 8, kind: input, shape index: {}]   ;;  %s830_s9 = inlined_call_operand.vmem [shape: f32[1,128], index: 9, kind: input, shape index: {}]   ;;  %s831_s10 = inlined_call_operand.hbm [shape: f32[8,128], index: 10, kind: output, shape index: {}]  }
   0x1   :  { %v568_v0 = vld [vmem:[%s823_s2 + $0x8] sm:$0xff]  ;;  %v567_v1 = vld [vmem:[%s823_s2] sm:$0xff]  ;;  %v472_v3 = vld [vmem:[%s825_s4 + $0x30] sm:$0xf] }
   0x2   :  { %v39_v2 = vld [vmem:[%s822_s1] sm:$0xff]  ;;  %v576_v4 = vld [vmem:[%s825_s4 + $0x34] sm:$0xf0]  ;;  %v575_v5 = vld [vmem:[%s825_s4 + $0x34] sm:$0xf]  ;;  %71 = vmatpush.bf16.msra.mxu2 %v568_v0 }
   0x3   :  { %v473_v6 = vor.u32 %v576_v4, %v472_v3  ;;  %v474_v7 = vld [vmem:[%s825_s4 + $0x38] sm:$0xf0]  ;;  %v464_v8 = vld [vmem:[%s825_s4 + $0x20] sm:$0xf]  ;;  %v574_v9 = vld [vmem:[%s825_s4 + $0x24] sm:$0xf0]  ;;  %v40_v14 = vpack.c.bf16 %v39_v2, %v39_v2 }
   0x4   :  { %v477_v10 = vor.u32 %v575_v5, %v474_v7  ;;  %v573_v11 = vld [vmem:[%s825_s4 + $0x24] sm:$0xf]  ;;  %v465_v12 = vor.u32 %v574_v9, %v464_v8  ;;  %v466_v13 = vld [vmem:[%s825_s4 + $0x28] sm:$0xf0] }
   0x5   :  { %142 = vmatpush.bf16.msra.mxu1 %v473_v6 }
   0x6   :  { %16 = vsyncpa [#allocation5], 0  ;;  %72 = vmatpush.bf16.msra.mxu2 %v567_v1  ;;  %vm61_vm0 = vcmask 261120   ;;  %v469_v15 = vor.u32 %v573_v11, %v466_v13  ;;  %v456_v16 = vld [vmem:[%s825_s4 + $0x10] sm:$0xf]  ;;  %v584_v28 = vld [vmem:[%s827_s6 + $0x38] sm:$0xff]  ;;  %v166_v44 = vlaneseq  ;;  %v174_v49 = vstv %s821_s0 }
   0x7   :  { %v572_v17 = vld [vmem:[%s825_s4 + $0x14] sm:$0xf0]  ;;  %v571_v18 = vld [vmem:[%s825_s4 + $0x14] sm:$0xf]  ;;  %v458_v20 = vld [vmem:[%s825_s4 + $0x18] sm:$0xf0]  ;;  %335 = vmatpush.bf16.msra.mxu3 %v584_v28 }
   0x8   :  { %v457_v19 = vor.u32 %v572_v17, %v456_v16  ;;  %v461_v21 = vor.u32 %v571_v18, %v458_v20  ;;  %v448_v22 = vld [vmem:[%s825_s4] sm:$0xf]  ;;  %v570_v23 = vld [vmem:[%s825_s4 + $0x4] sm:$0xf0]  ;;  %v569_v24 = vld [vmem:[%s825_s4 + $0x4] sm:$0xf] }
   0x9   :  { %143 = vmatpush.bf16.msra.mxu1 %v465_v12  ;;  %445 = vmatmul.msk.bf16.vlgmr.msra.gmra.mxu2 %vm61_vm0, %v40_v14  ;;  %v449_v25 = vor.u32 %v570_v23, %v448_v22  ;;  %v450_v26 = vld [vmem:[%s825_s4 + $0x8] sm:$0xf0]  ;;  %v592_v29 = vld [vmem:[%s827_s6 + $0x78] sm:$0xff]  ;;  %v583_v30 = vld [vmem:[%s827_s6 + $0x30] sm:$0xff]  ;;  %vm134_vm1 = vcmask 523264   ;;  %v167_v45 = vshrl.u32 %v166_v44, 7 }
   0xa   :  { %155 = vmatpush.bf16.msrb.mxu2 %v477_v10  ;;  %v453_v27 = vor.u32 %v569_v24, %v450_v26  ;;  %348 = vmatpush.bf16.msra.mxu0 %v592_v29  ;;  %v591_v31 = vld [vmem:[%s827_s6 + $0x70] sm:$0xff]  ;;  %v582_v32 = vld [vmem:[%s827_s6 + $0x28] sm:$0xff]  ;;  %v581_v34 = vld [vmem:[%s827_s6 + $0x20] sm:$0xff]  ;;  %v169_v46 = vand.u32 127, %v166_v44  ;;  %s428_s28 = sshll.u32 %s831_s10, 4  ;;  %s429_s28 = int_to_ptr.hbm [resolvable:$true] %s428_s28 }
   0xb   :  { %336 = vmatpush.bf16.msra.mxu3 %v583_v30  ;;  %v590_v33 = vld [vmem:[%s827_s6 + $0x68] sm:$0xff]  ;;  %v589_v35 = vld [vmem:[%s827_s6 + $0x60] sm:$0xff]  ;;  %v580_v36 = vld [vmem:[%s827_s6 + $0x18] sm:$0xff]  ;;  %v171_v47 = vmul.u32 256, %v167_v45 }
   0xc   :  { %v579_v37 = vld [vmem:[%s827_s6 + $0x10] sm:$0xff]  ;;  %v598_v38 = vld [vmem:[%s824_s3] ss:$0 sm:$0xff]  ;;  %v170_v50 = vadd.s32 128, %v169_v46  ;;  %v588_v53 = vld [vmem:[%s827_s6 + $0x58] sm:$0xff] }
   0xd   :  { %144 = vmatpush.bf16.msra.mxu1 %v457_v19  ;;  %v172_v48 = vadd.s32 %v171_v47, %v169_v46  ;;  %v578_v55 = vld [vmem:[%s827_s6 + $0x8] sm:$0xff]  ;;  %v587_v57 = vld [vmem:[%s827_s6 + $0x50] sm:$0xff]  ;;  %v577_v59 = vld [vmem:[%s827_s6] sm:$0xff] }
   0xe   :  { %156 = vmatpush.bf16.msrb.mxu2 %v469_v15  ;;  %349 = vmatpush.bf16.msra.mxu0 %v591_v31  ;;  %v173_v52 = vadd.s32 %v171_v47, %v170_v50  ;;  %v586_v61 = vld [vmem:[%s827_s6 + $0x48] sm:$0xff]  ;;  %v585_v0 = vld [vmem:[%s827_s6 + $0x40] sm:$0xff]  ;;  %v596_v4 = vld [vmem:[%s829_s8 + $0x18] sm:$0xff] }
   0xf   :  { %337 = vmatpush.bf16.msra.mxu3 %v582_v32  ;;  %v175_v51 = vadd.s32 %v174_v49, %v172_v48  ;;  %v88_v10 = vld [vmem:[%s826_s5] sm:$0x3]  ;;  %v595_v30 = vld [vmem:[%s829_s8 + $0x10] sm:$0xff]  ;;  %v594_v31 = vld [vmem:[%s829_s8 + $0x8] sm:$0xff] }
  0x10   :  { %v176_v56 = vadd.s32 %v174_v49, %v173_v52  ;;  %v90_v12 = vperm.slane %v88_v10, 0  ;;  %v91_v19 = vperm.slane %v88_v10, 1  ;;  %v593_v32 = vld [vmem:[%s829_s8] sm:$0xff] }
  0x11   :  { %145 = vmatpush.bf16.msra.mxu1 %v449_v25  ;;  %v177_v54 = vshrl.u32 %v175_v51, 16  ;;  %v600_v46 = vld [vmem:[%s830_s9] ss:$0 sm:$0xff] }
  0x12   :  { %157 = vmatpush.bf16.msrb.mxu2 %v461_v21  ;;  %350 = vmatpush.bf16.msra.mxu0 %v590_v33  ;;  %v178_v60 = vshrl.u32 %v176_v56, 16  ;;  %v599_v33 = vld [vmem:[%s828_s7] ss:$0 sm:$0xff]  ;;  %s627_s7 = smov [#allocation4]  }
  0x13   :  { %338 = vmatpush.bf16.msra.mxu3 %v581_v34  ;;  %v179_v58 = vxor.u32 %v177_v54, %v175_v51  ;;  %s426_s1 = sshll.u32 %s627_s7, 4  ;;  %s427_s1 = int_to_ptr.vmem [resolvable:$true] %s426_s1 }
  0x14   :  { %v180_v63 = vxor.u32 %v178_v60, %v176_v56 }
  0x15   :  { %v181_v62 = vmul.u32 2146121005, %v179_v58  ;;  %411 = vmatpush.bf16.msrb.mxu1 %v596_v4 }
  0x16   :  { %158 = vmatpush.bf16.msrb.mxu2 %v453_v27  ;;  %351 = vmatpush.bf16.msra.mxu0 %v589_v35  ;;  %v182_v2 = vmul.u32 2146121005, %v180_v63 }
  0x17   :  { %339 = vmatpush.bf16.msra.mxu3 %v580_v36  ;;  %v183_v1 = vshrl.u32 %v181_v62, 15 }
  0x18   :  { %v184_v5 = vshrl.u32 %v182_v2, 15 }
  0x19   :  { %v185_v3 = vxor.u32 %v183_v1, %v181_v62  ;;  %412 = vmatpush.bf16.msrb.mxu1 %v595_v30 }
  0x1a   :  { %352 = vmatpush.bf16.msra.mxu0 %v588_v53  ;;  %v186_v7 = vxor.u32 %v184_v5, %v182_v2 }
  0x1b   :  { %340 = vmatpush.bf16.msra.mxu3 %v579_v37  ;;  %v187_v6 = vmul.u32 2221713035, %v185_v3 }
  0x1c   :  { %v188_v9 = vmul.u32 2221713035, %v186_v7 }
  0x1d   :  { %v189_v8 = vshrl.u32 %v187_v6, 16  ;;  %413 = vmatpush.bf16.msrb.mxu1 %v594_v31 }
  0x1e   :  { %353 = vmatpush.bf16.msra.mxu0 %v587_v57  ;;  %v190_v13 = vshrl.u32 %v188_v9, 16 }
  0x1f   :  { %341 = vmatpush.bf16.msra.mxu3 %v578_v55  ;;  %v191_v11 = vxor.u32 %v189_v8, %v187_v6 }
  0x20   :  { %v192_v17 = vxor.u32 %v190_v13, %v188_v9 }
  0x21   :  { %v193_v14 = vshrl.u32 %v191_v11, 31  ;;  %414 = vmatpush.bf16.msrb.mxu1 %v593_v32  ;;  %v362_v34 = vshrl.u32 %v191_v11, 30 }
  0x22   :  { %354 = vmatpush.bf16.msra.mxu0 %v586_v61  ;;  %v194_v21 = vshrl.u32 %v192_v17, 31 }
  0x23   :  { %342 = vmatpush.bf16.msra.mxu3 %v577_v59  ;;  %vm195_vm2 = vcmp.eq.s32.totalorder %v193_v14, 1 }
  0x24   :  { %vm544_vm3 = vmpackc.low %vm195_vm2, %vm195_vm2  ;;  %vm196_vm4 = vcmp.eq.s32.totalorder %v194_v21, 1 }
  0x25   :  { %vm547_vm5 = vmpackc.low %vm196_vm4, %vm196_vm4 }
  0x26   :  { %355 = vmatpush.bf16.msra.mxu0 %v585_v0 }
  0x8c   :  { %v74_v39 = vpop.f32.mrf.mxu2 }
  0x8d   :  { %v75_v40 = vadd.f32 %v598_v38, %v74_v39  ;;  %v363_v38 = vand.u32 1, %v362_v34 }
  0x8f   :  { %v78_v41 = vmax.f32 %v75_v40, 0.0  ;;  %vm364_vm6 = vcmp.eq.s32.totalorder %v363_v38, 1 }
  0x91   :  { %v79_v42 = vpack.c.bf16 %v78_v41, %v78_v41 }
  0x93   :  { %478 = vmatmul.msk.bf16.vlgmr.msra.gmra.mxu1 %vm134_vm1, %v79_v42  ;;  %479 = vmatmul.msk.bf16.vlgmr.msrb.gmra.mxu2 %vm134_vm1, %v79_v42 }
  0x94   :  { %v76_v43 = vpop.f32.mrf.mxu2 }
 0x110   :  { %v147_v15 = vpop.f32.mrf.mxu1 }
 0x111   :  { %v148_v16 = vadd.f32 %v147_v15, %v90_v12 }
 0x113   :  { %v164_v18 = vmax.f32 %v148_v16, 0.0 }
 0x115   :  { %v197_v20 = vmul.f32 2.0, %v164_v18 }
 0x116   :  { %v160_v22 = vpop.f32.mrf.mxu2 }
 0x117   :  { %v545_v23 = vpack.c.bf16 %v197_v20, %v197_v20  ;;  %v161_v24 = vadd.f32 %v160_v22, %v91_v19 }
 0x118   :  { %v149_v25 = vpop.f32.mrf.mxu1 }
 0x119   :  { %v165_v26 = vmax.f32 %v161_v24, 0.0  ;;  %546 = vmatmul.msk.bf16.vlgmr.msra.gmra.mxu3 %vm544_vm3, %v545_v23 }
 0x11b   :  { %v198_v27 = vmul.f32 2.0, %v165_v26 }
 0x11d   :  { %v548_v28 = vpack.c.bf16 %v198_v27, %v198_v27 }
 0x11e   :  { %v162_v29 = vpop.f32.mrf.mxu2 }
 0x11f   :  { %549 = vmatmul.msk.bf16.vlgmr.msra.gmra.mxu0 %vm547_vm5, %v548_v28 }
 0x19c   :  { %v344_v35 = vpop.f32.mrf.mxu3  ;;  %v357_v36 = vpop.f32.mrf.mxu0 }
 0x19d   :  { %v345_v37 = vadd.f32 %v599_v33, %v344_v35 }
 0x19f   :  { %v358_v39 = vadd.f32 %v357_v36, %v345_v37 }
 0x1a1   :  { %v361_v40 = vmax.f32 %v358_v39, 0.0 }
 0x1a3   :  { %v365_v41 = vmul.f32 2.0, %v361_v40 }
 0x1a4   :  { %v346_v42 = vpop.f32.mrf.mxu3  ;;  %v359_v43 = vpop.f32.mrf.mxu0 }
 0x1a5   :  { %v366_v44 = vsel %vm364_vm6, %v365_v41, 0.0 }
 0x1a6   :  { %v367_v45 = vpack.c.bf16 %v366_v44, %v366_v44 }
 0x1a8   :  { %566 = vmatmul.msk.bf16.vlgmr.msrb.gmra.mxu1 %vm134_vm1, %v367_v45 }
 0x225   :  { %v416_v47 = vpop.f32.mrf.mxu1 }
 0x226   :  { %v417_v48 = vadd.f32 %v600_v46, %v416_v47 }
 0x228   :  { %420 = vst [vmem:[#allocation4] sm:$0xff] %v417_v48 }
 0x229   :  { %431 = dma.vmem_to_hbm [thread:$0]  %s427_s1, 128, %s429_s28, [#allocation5]  }
 0x22d   :  { %v418_v49 = vpop.f32.mrf.mxu1 }
 0x22e   :  { %625 = dma.done.wait [#allocation5], 128  }
 0x22f   :  { %626 = vsyncadd [#allocation5], 4294967168 }
 0x230   :  { %436 = vsyncpa [#allocation5], 1 }

</bundles_post_ra>
